<compile_context>
chip_gen: v7x
topology: tpu7x:2x2x1
jax: 0.10.0
libtpu: 0.0.40
codegen_flags: <defaults>
</compile_context>

<pallas_src>
import functools

import jax
import jax.numpy as jnp
from jax.experimental import pallas as pl
from jax.experimental.pallas import tpu as pltpu


def critic_mlp_kernel(x_ref, w1_ref, b1_ref, w2_ref, b2_ref, out_ref, *, activate):
    # x_ref: (TB, D), w1_ref: (D, H), b1_ref: (1, H),
    # w2_ref: (H, O), b2_ref: (1, O), out_ref: (TB, O)
    x = x_ref[...]

    # Linear 1 + ReLU (MXU matmul, f32 accumulation).
    h = jnp.dot(x, w1_ref[...], preferred_element_type=jnp.float32) + b1_ref[...]
    h = jnp.maximum(h, 0.0)

    # Linear 2.
    logits = jnp.dot(h, w2_ref[...], preferred_element_type=jnp.float32) + b2_ref[...]

    if activate:
        # Numerically stable softmax over the last (feature) axis.
        # Exact division (not approx reciprocal): keeps rows summing to 1
        # within f32 eps and costs nothing on this HBM-bound kernel.
        m = jnp.max(logits, axis=-1, keepdims=True)
        e = jnp.exp(logits - m)
        logits = e / jnp.sum(e, axis=-1, keepdims=True)

    out_ref[...] = logits.astype(out_ref.dtype)


def _pick_tile_b(B):
    """Adaptive batch tile.

    * B < 64: one grid step (pure launch/DMA-latency regime, nothing to split).
    * B >= 64: split into >= 2 steps so the "parallel" batch axis keeps both
      v7x TensorCores busy and DMA overlaps compute.
    * Large B: prefer 2048-8192-row tiles while keeping >= 4 grid steps
      (amortizes the ~0.35 us/step pipeline overhead; at D=32 even an
      8192-row f32 tile is ~1 MiB, well inside every generation's VMEM).
    """
    if B < 64:
        return B
    for t in (8192, 4096, 2048):
        if B % t == 0 and B // t >= 4:
            return t
    for t in (1024, 512, 256, 128, 64, 32, 16, 8):
        if B % t == 0 and B // t >= 2:
            return t
    return B  # awkward batch sizes: fall back to a single full-batch step


def critic_mlp(x, w1, b1, w2, b2, *, activate=True, tile_b=None):
    """x: (..., D) f32; w1: (D, H); b1: (1, H); w2: (H, O); b2: (1, O) -> (..., O) f32."""
    orig_shape = x.shape
    D = orig_shape[-1]
    x2 = x.reshape(-1, D)
    B = x2.shape[0]
    H = w1.shape[1]
    O = w2.shape[1]

    tb = _pick_tile_b(B) if tile_b is None else tile_b
    if B % tb != 0:
        raise ValueError(f"tile_b={tb} must divide the (flattened) batch {B}")
    if tb != B and tb % 8 != 0:
        # (8, 128) sublane rule: a partial batch block must be a multiple of 8 rows.
        raise ValueError(f"tile_b={tb} must be a multiple of 8 or equal to the batch")

    kernel = functools.partial(critic_mlp_kernel, activate=activate)

    out = pl.pallas_call(
        kernel,
        out_shape=jax.ShapeDtypeStruct((B, O), jnp.float32),
        grid=(B // tb,),
        in_specs=[
            pl.BlockSpec((tb, D), lambda i: (i, 0)),   # x: tiled over batch
            pl.BlockSpec((D, H), lambda i: (0, 0)),    # w1: resident in VMEM
            pl.BlockSpec((1, H), lambda i: (0, 0)),    # b1
            pl.BlockSpec((H, O), lambda i: (0, 0)),    # w2 (unpadded: O is the full dim)
            pl.BlockSpec((1, O), lambda i: (0, 0)),    # b2
        ],
        # Output stays (B, O): a few masked stores per tile beat the ~32x HBM
        # write amplification of a 128-lane-padded output slab at O=4.
        out_specs=pl.BlockSpec((tb, O), lambda i: (i, 0)),
        compiler_params=pltpu.CompilerParams(
            dimension_semantics=("parallel",),  # v7x: batch axis sharded over TCs
            # At production D/H: set vmem_limit_bytes, single-buffer the
            # resident weights via pipeline_mode=pl.Buffered(1), and cap tb
            # for v7x's 64 MiB VMEM.  Irrelevant at D=32/H=16.
        ),
    )(x2, w1, b1, w2, b2)

    return out.reshape(*orig_shape[:-1], O)


def reference(x, w1, b1, w2, b2, activate=True):
    h = jnp.maximum(x @ w1 + b1, 0.0)
    logits = h @ w2 + b2
    if activate:
        logits = jax.nn.softmax(logits, axis=-1)
    return logits


if __name__ == "__main__":
    # Shapes implied by the module: input_shape = (D,) with D = 32
    #   -> hidden H = D // 2 = 16, num_train_subjects -> O = 4.
    B, D = 16, 32
    H = D // 2
    O = 4

    key = jax.random.PRNGKey(0)
    kx, k1, k2, k3, k4, kb = jax.random.split(key, 6)

    x = jax.random.normal(kx, (B, D), dtype=jnp.float32)

    # Deterministic parameter init (uniform, roughly matching nn.Linear scale).
    lim1 = 1.0 / jnp.sqrt(D)
    lim2 = 1.0 / jnp.sqrt(H)
    w1 = jax.random.uniform(k1, (D, H), minval=-lim1, maxval=lim1, dtype=jnp.float32)
    b1 = jax.random.uniform(k2, (1, H), minval=-lim1, maxval=lim1, dtype=jnp.float32)
    w2 = jax.random.uniform(k3, (H, O), minval=-lim2, maxval=lim2, dtype=jnp.float32)
    b2 = jax.random.uniform(k4, (1, O), minval=-lim2, maxval=lim2, dtype=jnp.float32)

    # activate=True (softmax).  2e-3 elementwise tolerance covers possible
    # MXU-vs-XLA default-precision matmul differences on hardware; the row-sum
    # check is tight (1e-5) because the softmax normalization is now exact.
    out = jax.block_until_ready(critic_mlp(x, w1, b1, w2, b2, activate=True))
    ref = reference(x, w1, b1, w2, b2, activate=True)
    assert out.shape == (B, O)
    assert jnp.allclose(out, ref, atol=2e-3, rtol=2e-3), "softmax mismatch vs reference"
    assert jnp.allclose(jnp.sum(out, axis=-1), 1.0, atol=1e-5), "softmax rows must sum to 1"

    # activate=False (raw logits).
    out_raw = jax.block_until_ready(critic_mlp(x, w1, b1, w2, b2, activate=False))
    ref_raw = reference(x, w1, b1, w2, b2, activate=False)
    assert jnp.allclose(out_raw, ref_raw, atol=2e-3, rtol=2e-3), "logits mismatch vs reference"

    # Multi-step grid path (exercises batch tiling + "parallel" semantics).
    xb = jax.random.normal(kb, (128, D), dtype=jnp.float32)
    out_b = jax.block_until_ready(critic_mlp(xb, w1, b1, w2, b2, activate=True))
    ref_b = reference(xb, w1, b1, w2, b2, activate=True)
    assert out_b.shape == (128, O)
    assert jnp.allclose(out_b, ref_b, atol=2e-3, rtol=2e-3), "tiled-path mismatch vs reference"
    assert jnp.allclose(jnp.sum(out_b, axis=-1), 1.0, atol=1e-5)

    print("KERNEL_OK")
</pallas_src>

<mosaic_0001>
module attributes {stable_mosaic.version = 11 : i64} {
  func.func @critic_mlp_kernel(%arg0: i32, %arg1: memref<16x32xf32, #tpu.memory_space<vmem>>, %arg2: memref<32x16xf32, #tpu.memory_space<vmem>>, %arg3: memref<1x16xf32, #tpu.memory_space<vmem>>, %arg4: memref<16x4xf32, #tpu.memory_space<vmem>>, %arg5: memref<1x4xf32, #tpu.memory_space<vmem>>, %arg6: memref<16x4xf32, #tpu.memory_space<vmem>>) attributes {dimension_semantics = [#tpu.dimension_semantics<parallel>], iteration_bounds = array<i64: 1>, scalar_prefetch = 0 : i64, scratch_operands = 0 : i64, tpu.core_type = #tpu.core_type<tc>, window_params = [{transform_indices = @transform_0, window_bounds = array<i64: 16, 32>}, {pipeline_mode = #tpu.pipeline_mode<synchronous>, transform_indices = @transform_1, window_bounds = array<i64: 32, 16>}, {pipeline_mode = #tpu.pipeline_mode<synchronous>, transform_indices = @transform_2, window_bounds = array<i64: 1, 16>}, {pipeline_mode = #tpu.pipeline_mode<synchronous>, transform_indices = @transform_3, window_bounds = array<i64: 16, 4>}, {pipeline_mode = #tpu.pipeline_mode<synchronous>, transform_indices = @transform_4, window_bounds = array<i64: 1, 4>}, {transform_indices = @transform_5, window_bounds = array<i64: 16, 4>}]} {
    %c0 = arith.constant 0 : index
    %c0_0 = arith.constant 0 : index
    %0 = vector.load %arg1[%c0, %c0_0] : memref<16x32xf32, #tpu.memory_space<vmem>>, vector<16x32xf32>
    %c0_1 = arith.constant 0 : index
    %c0_2 = arith.constant 0 : index
    %1 = vector.load %arg2[%c0_1, %c0_2] : memref<32x16xf32, #tpu.memory_space<vmem>>, vector<32x16xf32>
    %cst = arith.constant dense<0.000000e+00> : vector<16x16xf32>
    %2 = tpu.matmul %0, %1, %cst {dimension_numbers = #tpu.dot_dimension_numbers<[1], [0], [0], [1], [0, 0, 1, 1], [], []>} : vector<16x32xf32>, vector<32x16xf32>, vector<16x16xf32> -> vector<16x16xf32>
    %c0_3 = arith.constant 0 : index
    %c0_4 = arith.constant 0 : index
    %3 = vector.load %arg3[%c0_3, %c0_4] : memref<1x16xf32, #tpu.memory_space<vmem>>, vector<1x16xf32>
    %4 = vector.broadcast %3 : vector<1x16xf32> to vector<16x16xf32>
    %5 = arith.addf %2, %4 : vector<16x16xf32>
    %cst_5 = arith.constant 0.000000e+00 : f32
    %6 = vector.broadcast %cst_5 : f32 to vector<16x16xf32>
    %7 = arith.maximumf %5, %6 : vector<16x16xf32>
    %c0_6 = arith.constant 0 : index
    %c0_7 = arith.constant 0 : index
    %8 = vector.load %arg4[%c0_6, %c0_7] : memref<16x4xf32, #tpu.memory_space<vmem>>, vector<16x4xf32>
    %cst_8 = arith.constant dense<0.000000e+00> : vector<16x4xf32>
    %9 = tpu.matmul %7, %8, %cst_8 {dimension_numbers = #tpu.dot_dimension_numbers<[1], [0], [0], [1], [0, 0, 1, 1], [], []>} : vector<16x16xf32>, vector<16x4xf32>, vector<16x4xf32> -> vector<16x4xf32>
    %c0_9 = arith.constant 0 : index
    %c0_10 = arith.constant 0 : index
    %10 = vector.load %arg5[%c0_9, %c0_10] : memref<1x4xf32, #tpu.memory_space<vmem>>, vector<1x4xf32>
    %11 = vector.broadcast %10 : vector<1x4xf32> to vector<16x4xf32>
    %12 = arith.addf %9, %11 : vector<16x4xf32>
    %cst_11 = arith.constant dense<0xFF800000> : vector<16xf32>
    %13 = vector.multi_reduction <maximumf>, %12, %cst_11 [1] : vector<16x4xf32> to vector<16xf32>
    %14 = vector.shape_cast %13 : vector<16xf32> to vector<16x1xf32>
    %15 = vector.broadcast %14 : vector<16x1xf32> to vector<16x4xf32>
    %16 = arith.subf %12, %15 : vector<16x4xf32>
    %17 = math.exp %16 : vector<16x4xf32>
    %cst_12 = arith.constant dense<0.000000e+00> : vector<16xf32>
    %18 = vector.multi_reduction <add>, %17, %cst_12 [1] : vector<16x4xf32> to vector<16xf32>
    %19 = vector.shape_cast %18 : vector<16xf32> to vector<16x1xf32>
    %20 = vector.broadcast %19 : vector<16x1xf32> to vector<16x4xf32>
    %21 = arith.divf %17, %20 : vector<16x4xf32>
    %c0_13 = arith.constant 0 : index
    %c0_14 = arith.constant 0 : index
    %22 = vector.load %arg6[%c0_13, %c0_14] : memref<16x4xf32, #tpu.memory_space<vmem>>, vector<16x4xf32>
    tpu.vector_store %arg6[%c0_13, %c0_14], %21 {strides = array<i32>} : memref<16x4xf32, #tpu.memory_space<vmem>>, vector<16x4xf32>,
    return
  }
  func.func @transform_0(%arg0: i32) -> (i32, i32) {
    %c0_i32 = arith.constant 0 : i32
    %c0_i32_0 = arith.constant 0 : i32
    return %arg0, %c0_i32 : i32, i32
  }
  func.func @transform_1(%arg0: i32) -> (i32, i32) {
    %c0_i32 = arith.constant 0 : i32
    %c0_i32_0 = arith.constant 0 : i32
    %c0_i32_1 = arith.constant 0 : i32
    return %c0_i32, %c0_i32_0 : i32, i32
  }
  func.func @transform_2(%arg0: i32) -> (i32, i32) {
    %c0_i32 = arith.constant 0 : i32
    %c0_i32_0 = arith.constant 0 : i32
    %c0_i32_1 = arith.constant 0 : i32
    return %c0_i32, %c0_i32_0 : i32, i32
  }
  func.func @transform_3(%arg0: i32) -> (i32, i32) {
    %c0_i32 = arith.constant 0 : i32
    %c0_i32_0 = arith.constant 0 : i32
    %c0_i32_1 = arith.constant 0 : i32
    return %c0_i32, %c0_i32_0 : i32, i32
  }
  func.func @transform_4(%arg0: i32) -> (i32, i32) {
    %c0_i32 = arith.constant 0 : i32
    %c0_i32_0 = arith.constant 0 : i32
    %c0_i32_1 = arith.constant 0 : i32
    return %c0_i32, %c0_i32_0 : i32, i32
  }
  func.func @transform_5(%arg0: i32) -> (i32, i32) {
    %c0_i32 = arith.constant 0 : i32
    %c0_i32_0 = arith.constant 0 : i32
    return %arg0, %c0_i32 : i32, i32
  }
}

</mosaic_0001>

<bundles_post_ra>
// kernel: tpu_custom_call.1
= control target key start
LH: loop header
LB: loop body
LE: loop exit
PB: predicated region body
PF: predicated region fallthrough
CT: control target
= control target key end

     0   :  { %vm33_vm0 = vcmask 261120   ;;  %vm126_vm1 = vcmask 130048   ;;  %vm208_vm2 = vcmask 31744   ;;  %s363_s1 = inlined_call_operand.vmem [shape: f32[32,16], index: 1, kind: input, shape index: {}]   ;;  %s364_s0 = inlined_call_operand.vmem [shape: f32[16,32], index: 0, kind: input, shape index: {}]   ;;  %s365_s3 = inlined_call_operand.vmem [shape: f32[16,4], index: 3, kind: input, shape index: {}]   ;;  %s366_s2 = inlined_call_operand.vmem [shape: f32[1,16], index: 2, kind: input, shape index: {}]   ;;  %s367_s4 = inlined_call_operand.vmem [shape: f32[1,4], index: 4, kind: input, shape index: {}]   ;;  %s368_s5 = inlined_call_operand.vmem [shape: f32[16,4], index: 5, kind: output, shape index: {}]  }
   0x1   :  { %v22_v0 = vld [vmem:[%s363_s1] sm:$0xff]  ;;  %v23_v1 = vld [vmem:[%s363_s1 + $0x8] sm:$0xff]  ;;  %v24_v2 = vld [vmem:[%s363_s1 + $0x10] sm:$0xff] }
   0x2   :  { %v271_v3 = vpack.c.bf16 %v23_v1, %v22_v0  ;;  %v25_v4 = vld [vmem:[%s363_s1 + $0x18] sm:$0xff]  ;;  %v20_v5 = vld [vmem:[%s364_s0] sm:$0xff]  ;;  %v21_v7 = vld [vmem:[%s364_s0 + $0x8] sm:$0xff] }
   0x3   :  { %v275_v6 = vpack.c.bf16 %v25_v4, %v24_v2  ;;  %261 = vmatprep.mubr.msk.f32.mxu0 %vm33_vm0, %v20_v5  ;;  %v117_v8 = vld [vmem:[%s365_s3] sm:$0xff]  ;;  %v118_v9 = vld [vmem:[%s365_s3 + $0x8] sm:$0xff] }
   0x4   :  { %272 = vmatprep.subr.bf16.mxu0 %v271_v3  ;;  %v279_v10 = vpack.c.bf16 %v118_v9, %v117_v8  ;;  %v237_v11 = vld [vmem:[%s366_s2] ss:$0 sm:$0xff] }
   0x5   :  { %274 = vmatpush3.bf16.msra.mxu0 %v271_v3  ;;  %v240_v18 = vld [vmem:[%s367_s4] ss:$0 sm:$0xff] }
   0x6   :  { %276 = vmatprep.subr.bf16.mxu0 %v275_v6  ;;  %280 = vmatprep.subr.bf16.mxu1 %v279_v10 }
   0x7   :  { %282 = vmatpush3.bf16.msra.mxu1 %v279_v10 }
   0x9   :  { %278 = vmatpush3.bf16.msra.mxu0 %v275_v6 }
   0xc   :  { %262 = vmatmul.mubr.msk.f32.vlgmr.msra.gmra.mrb[0].mxu0 %vm33_vm0, %v21_v7 }
  0xdf   :  { %v263_v12 = vpop.f32.mrb[0].mxu0 }
  0xe0   :  { %v112_v13 = vadd.f32 %v263_v12, %v237_v11  ;;  %v106_v14 = vpop.f32.mrb[1].mxu0 }
  0xe1   :  { %v107_v15 = vadd.f32 %v237_v11, %v106_v14 }
  0xe2   :  { %v116_v17 = vmax.f32 %v112_v13, 0.0 }
  0xe3   :  { %v115_v16 = vmax.f32 %v107_v15, 0.0 }
  0xe5   :  { %268 = vmatprep.mubr.msk.f32.mxu1 %vm126_vm1, %v115_v16 }
  0xe6   :  { %269 = vmatmul.mubr.msk.f32.vlgmr.msra.gmra.mrb[0].mxu1 %vm126_vm1, %v116_v17 }
 0x1b9   :  { %v270_v19 = vpop.f32.mrb[0].mxu1 }
 0x1ba   :  { %v199_v20 = vpop.f32.mrb[1].mxu1  ;;  %v205_v22 = vadd.f32 %v270_v19, %v240_v18 }
 0x1bb   :  { %v200_v21 = vadd.f32 %v240_v18, %v199_v20 }
 0x1bc   :  { %v212_v24 = vsel %vm208_vm2, %v205_v22, -inf }
 0x1bd   :  { %v209_v23 = vsel %vm208_vm2, %v200_v21, -inf }
 0x1be   :  { %210 = vmax.xlane.f32.xlu0 %v209_v23 }
 0x1c2   :  { %213 = vmax.xlane.f32.xlu0 %v212_v24 }
 0x24b   :  { %v211_v25 = vpop.xlane.xlu0 %210 }
 0x24c   :  { %v215_v26 = vsub.f32 %v200_v21, %v211_v25 }
 0x24e   :  { %v217_v27 = vmul.f32 1.442695, %v215_v26 }
 0x24f   :  { %v214_v28 = vpop.xlane.xlu0 %213 }
 0x250   :  { %283 = vpow2.f32 %v217_v27  ;;  %v216_v29 = vsub.f32 %v205_v22, %v214_v28 }
 0x252   :  { %v219_v30 = vmul.f32 1.442695, %v216_v29 }
 0x254   :  { %285 = vpow2.f32 %v219_v30 }
 0x25a   :  { %v284_v31 = vpop.eup %283 }
 0x25b   :  { %v221_v32 = vsel %vm208_vm2, %v284_v31, 0.0 }
 0x25c   :  { %222 = vadd.xlane.f32.xlu1 %v221_v32 }
 0x25e   :  { %v286_v33 = vpop.eup %285 }
 0x25f   :  { %v224_v34 = vsel %vm208_vm2, %v286_v33, 0.0 }
 0x260   :  { %225 = vadd.xlane.f32.xlu1 %v224_v34 }
 0x2e9   :  { %v223_v35 = vpop.xlane.xlu1 %222 }
 0x2ea   :  { %287 = vrcp.f32 %v223_v35 }
 0x2ed   :  { %v226_v36 = vpop.xlane.xlu1 %225 }
 0x2ee   :  { %289 = vrcp.f32 %v226_v36 }
 0x2f4   :  { %v288_v37 = vpop.eup %287 }
 0x2f5   :  { %v228_v38 = vmul.f32 %v288_v37, %v284_v31 }
 0x2f7   :  { %231 = vst.msk [vmem:[%s368_s5] sm:$0xff] %vm208_vm2, %v228_v38 }
 0x2f8   :  { %v290_v39 = vpop.eup %289 }
 0x2f9   :  { %v230_v40 = vmul.f32 %v290_v39, %v286_v33 }
 0x2fb   :  { %232 = vst.msk [vmem:[%s368_s5 + $0x8] sm:$0xff] %vm208_vm2, %v230_v40 }

</bundles_post_ra>
